<compile_context>
chip_gen: v7x
topology: tpu7x:2x2x1
jax: 0.10.0
libtpu: 0.0.40
codegen_flags: <defaults>
</compile_context>

<pallas_src>
import functools

import jax
import jax.numpy as jnp
from jax.experimental import pallas as pl
from jax.experimental.pallas import tpu as pltpu


def _cross_attention_kernel(x_ref, mem_ref,
                            wq_ref, wkv_ref, wo_ref,
                            params_ref,
                            out_ref,
                            *, num_heads, eps):
    # Block shapes (leading batch dim of 1 indexed away):
    #   x_ref    : (1, S, E) f32     mem_ref : (1, M, E) f32
    #   wq_ref   : (E, E)  bf16  (in, out), 1/sqrt(dh) pre-folded
    #   wkv_ref  : (E, 2E) bf16  (in, out), [Wk | Wv]
    #   wo_ref   : (E, E)  bf16  (in, out)
    #   params_ref : (6, E) f32  rows = [bq*scale, bk, bv, bo, gamma, beta]
    #   out_ref  : (1, S, E)
    x = x_ref[0]          # (S, E) f32 (kept f32 for the residual path)
    mem = mem_ref[0]      # (M, E) f32

    params = params_ref[...]            # (6, E) f32
    bq = params[0:1, :]
    bk = params[1:2, :]
    bv = params[2:3, :]
    bo = params[3:4, :]
    gamma = params[4:5, :]
    beta = params[5:6, :]

    E = x.shape[-1]
    dh = E // num_heads

    x_b = x.astype(jnp.bfloat16)
    mem_b = mem.astype(jnp.bfloat16)

    # Q projection (scale already folded into wq / bq).
    q = jnp.dot(x_b, wq_ref[...], preferred_element_type=jnp.float32) + bq   # (S, E)

    # Fused K/V projection: one (M, E) @ (E, 2E) matmul, then lane-aligned slices.
    kv = jnp.dot(mem_b, wkv_ref[...], preferred_element_type=jnp.float32)    # (M, 2E)
    k = kv[:, :E] + bk                                                        # (M, E)
    v = kv[:, E:] + bv                                                        # (M, E)

    q_b = q.astype(jnp.bfloat16)
    k_b = k.astype(jnp.bfloat16)
    v_b = v.astype(jnp.bfloat16)

    # Per-head attention with per-head output-projection accumulation
    # (no concatenate across heads -> no lane relayout).
    acc = jnp.zeros((x.shape[0], E), dtype=jnp.float32)                      # (S, E)
    for h in range(num_heads):
        sl = slice(h * dh, (h + 1) * dh)
        qh = q_b[:, sl]       # (S, dh)
        kh = k_b[:, sl]       # (M, dh)
        vh = v_b[:, sl]       # (M, dh)

        # scores = qh @ kh^T  -- contract over dh, no explicit transpose.
        s = jax.lax.dot_general(
            qh, kh,
            dimension_numbers=(((1,), (1,)), ((), ())),
            preferred_element_type=jnp.float32)                              # (S, M) f32

        # Numerically-stable softmax over the key axis (f32 VPU math).
        s = s - jnp.max(s, axis=-1, keepdims=True)
        p = jnp.exp(s)
        denom = jnp.sum(p, axis=-1, keepdims=True)
        attn = p * pl.reciprocal(denom, approx=True)                          # EUP vrcp

        ctx_h = jnp.dot(attn.astype(jnp.bfloat16), vh,
                        preferred_element_type=jnp.float32)                   # (S, dh)

        # Per-head slice of Wo: (dh, E) rows, lane-dense N = E output.
        acc = acc + jnp.dot(ctx_h.astype(jnp.bfloat16), wo_ref[sl, :],
                            preferred_element_type=jnp.float32)               # (S, E)

    attn_out = acc + bo

    # Residual + LayerNorm (f32), one-pass variance, gamma fused with inv-stddev.
    y = x + attn_out
    mean = jnp.mean(y, axis=-1, keepdims=True)
    mean_sq = jnp.mean(y * y, axis=-1, keepdims=True)
    var = mean_sq - mean * mean
    inv = jax.lax.rsqrt(var + eps)
    out = (y - mean) * (inv * gamma) + beta

    out_ref[0] = out.astype(out_ref.dtype)


@functools.partial(jax.jit, static_argnames=("num_heads", "eps"))
def cross_attention(out_seq, in_seq,
                    in_proj_w, in_proj_b, out_proj_w, out_proj_b,
                    ln_gamma, ln_beta, *, num_heads, eps=1e-5):
    """Pallas implementation of CrossAttention.forward (batch-major layout).

    Args:
      out_seq:    (B, S, E)  query sequence
      in_seq:     (B, M, E)  key/value sequence
      in_proj_w:  (3E, E)    packed nn.MultiheadAttention in_proj weight (PyTorch layout)
      in_proj_b:  (3E,)      packed in_proj bias
      out_proj_w: (E, E)     out_proj.weight (PyTorch layout)
      out_proj_b: (E,)       out_proj.bias
      ln_gamma:   (E,)       LayerNorm weight
      ln_beta:    (E,)       LayerNorm bias
    Returns:
      (B, S, E) layer-normalized (out_seq + attention(out_seq, in_seq, in_seq)).
    """
    B, S, E = out_seq.shape
    _, M, _ = in_seq.shape
    dh = E // num_heads
    scale = 1.0 / float(dh) ** 0.5

    # Glue (host-side, one-time): split packed QKV weights, convert to (in, out),
    # fold the softmax scale into Wq / bq, pack K/V weights side-by-side, and cast
    # all matmul weights to bf16 (halves weight DMA traffic).
    wq = (in_proj_w[:E].T * scale).astype(jnp.bfloat16)                       # (E, E)
    wkv = jnp.concatenate([in_proj_w[E:2 * E].T, in_proj_w[2 * E:].T],
                          axis=1).astype(jnp.bfloat16)                        # (E, 2E)
    wo = out_proj_w.T.astype(jnp.bfloat16)                                    # (E, E)

    # Pack the six (E,) vectors into one (6, E) f32 array:
    # rows = [bq*scale, bk, bv, bo, gamma, beta].
    params = jnp.stack([in_proj_b[:E] * scale,
                        in_proj_b[E:2 * E],
                        in_proj_b[2 * E:],
                        out_proj_b,
                        ln_gamma,
                        ln_beta], axis=0).astype(jnp.float32)                 # (6, E)

    kernel = functools.partial(_cross_attention_kernel,
                               num_heads=num_heads, eps=eps)

    return pl.pallas_call(
        kernel,
        out_shape=jax.ShapeDtypeStruct((B, S, E), out_seq.dtype),
        grid=(B,),
        in_specs=[
            pl.BlockSpec((1, S, E), lambda b: (b, 0, 0)),   # out_seq
            pl.BlockSpec((1, M, E), lambda b: (b, 0, 0)),   # in_seq
            pl.BlockSpec((E, E), lambda b: (0, 0)),         # Wq (scaled)
            pl.BlockSpec((E, 2 * E), lambda b: (0, 0)),     # Wkv packed
            pl.BlockSpec((E, E), lambda b: (0, 0)),         # Wo
            pl.BlockSpec((6, E), lambda b: (0, 0)),         # packed biases / LN params
        ],
        out_specs=pl.BlockSpec((1, S, E), lambda b: (b, 0, 0)),
        compiler_params=pltpu.CompilerParams(
            dimension_semantics=("parallel",),
            vmem_limit_bytes=32 * 1024 * 1024),
    )(out_seq, in_seq, wq, wkv, wo, params)


def _reference(out_seq, in_seq, in_proj_w, in_proj_b, out_proj_w, out_proj_b,
               ln_gamma, ln_beta, *, num_heads, eps=1e-5):
    """Pure-JAX f32 reference matching nn.MultiheadAttention + residual + LayerNorm."""
    B, S, E = out_seq.shape
    _, M, _ = in_seq.shape
    dh = E // num_heads
    wq, wk, wv = in_proj_w[:E], in_proj_w[E:2 * E], in_proj_w[2 * E:]
    bq, bk, bv = in_proj_b[:E], in_proj_b[E:2 * E], in_proj_b[2 * E:]

    q = jnp.einsum("bse,fe->bsf", out_seq, wq) + bq
    k = jnp.einsum("bme,fe->bmf", in_seq, wk) + bk
    v = jnp.einsum("bme,fe->bmf", in_seq, wv) + bv

    q = q.reshape(B, S, num_heads, dh).transpose(0, 2, 1, 3)
    k = k.reshape(B, M, num_heads, dh).transpose(0, 2, 1, 3)
    v = v.reshape(B, M, num_heads, dh).transpose(0, 2, 1, 3)

    s = jnp.einsum("bhsd,bhmd->bhsm", q, k) * (1.0 / float(dh) ** 0.5)
    attn = jax.nn.softmax(s, axis=-1)
    ctx = jnp.einsum("bhsm,bhmd->bhsd", attn, v)
    ctx = ctx.transpose(0, 2, 1, 3).reshape(B, S, E)

    attn_out = jnp.einsum("bse,fe->bsf", ctx, out_proj_w) + out_proj_b
    y = out_seq + attn_out
    mean = y.mean(-1, keepdims=True)
    var = ((y - mean) ** 2).mean(-1, keepdims=True)
    return (y - mean) / jnp.sqrt(var + eps) * ln_gamma + ln_beta


if __name__ == "__main__":
    key = jax.random.PRNGKey(0)
    B, S_out, S_in = 2, 8, 16
    E, H = 128, 4            # embed_dim multiple of 128 -> lane-dense tiles/stores

    ks = jax.random.split(key, 8)
    out_seq = jax.random.normal(ks[0], (B, S_out, E), dtype=jnp.float32)
    in_seq = jax.random.normal(ks[1], (B, S_in, E), dtype=jnp.float32)

    a = 1.0 / float(E) ** 0.5   # xavier-like uniform bound
    in_proj_w = jax.random.uniform(ks[2], (3 * E, E), jnp.float32, -1.0, 1.0) * a
    in_proj_b = jax.random.uniform(ks[3], (3 * E,), jnp.float32, -1.0, 1.0) * a
    out_proj_w = jax.random.uniform(ks[4], (E, E), jnp.float32, -1.0, 1.0) * a
    out_proj_b = jax.random.uniform(ks[5], (E,), jnp.float32, -1.0, 1.0) * a
    ln_gamma = 1.0 + 0.1 * jax.random.normal(ks[6], (E,), dtype=jnp.float32)
    ln_beta = 0.1 * jax.random.normal(ks[7], (E,), dtype=jnp.float32)

    y = cross_attention(out_seq, in_seq, in_proj_w, in_proj_b,
                        out_proj_w, out_proj_b, ln_gamma, ln_beta, num_heads=H)
    jax.block_until_ready(y)

    y_ref = _reference(out_seq, in_seq, in_proj_w, in_proj_b,
                       out_proj_w, out_proj_b, ln_gamma, ln_beta, num_heads=H)

    assert y.shape == (B, S_out, E)
    max_err = float(jnp.max(jnp.abs(y - y_ref)))
    # bf16 MXU operands with f32 accumulation -> loosened tolerance vs pure-f32 ref.
    assert jnp.allclose(y, y_ref, rtol=2e-2, atol=2e-2), f"max abs err {max_err}"

    print("KERNEL_OK")
</pallas_src>

<mosaic_0001>
module attributes {stable_mosaic.version = 11 : i64} {
  func.func @_cross_attention_kernel(%arg0: i32, %arg1: memref<1x8x128xf32, #tpu.memory_space<vmem>>, %arg2: memref<1x16x128xf32, #tpu.memory_space<vmem>>, %arg3: memref<128x128xbf16, #tpu.memory_space<vmem>>, %arg4: memref<128x256xbf16, #tpu.memory_space<vmem>>, %arg5: memref<128x128xbf16, #tpu.memory_space<vmem>>, %arg6: memref<6x128xf32, #tpu.memory_space<vmem>>, %arg7: memref<1x8x128xf32, #tpu.memory_space<vmem>>) attributes {dimension_semantics = [#tpu.dimension_semantics<parallel>], iteration_bounds = array<i64: 2>, scalar_prefetch = 0 : i64, scratch_operands = 0 : i64, tpu.core_type = #tpu.core_type<tc>, window_params = [{transform_indices = @transform_0, window_bounds = array<i64: 1, 8, 128>}, {transform_indices = @transform_1, window_bounds = array<i64: 1, 16, 128>}, {pipeline_mode = #tpu.pipeline_mode<synchronous>, transform_indices = @transform_2, window_bounds = array<i64: 128, 128>}, {pipeline_mode = #tpu.pipeline_mode<synchronous>, transform_indices = @transform_3, window_bounds = array<i64: 128, 256>}, {pipeline_mode = #tpu.pipeline_mode<synchronous>, transform_indices = @transform_4, window_bounds = array<i64: 128, 128>}, {pipeline_mode = #tpu.pipeline_mode<synchronous>, transform_indices = @transform_5, window_bounds = array<i64: 6, 128>}, {transform_indices = @transform_6, window_bounds = array<i64: 1, 8, 128>}]} {
    %c0 = arith.constant 0 : index
    %c0_0 = arith.constant 0 : index
    %c0_1 = arith.constant 0 : index
    %0 = vector.load %arg1[%c0, %c0_0, %c0_1] : memref<1x8x128xf32, #tpu.memory_space<vmem>>, vector<1x8x128xf32>
    %1 = vector.shape_cast %0 : vector<1x8x128xf32> to vector<8x128xf32>
    %c0_2 = arith.constant 0 : index
    %c0_3 = arith.constant 0 : index
    %c0_4 = arith.constant 0 : index
    %2 = vector.load %arg2[%c0_2, %c0_3, %c0_4] : memref<1x16x128xf32, #tpu.memory_space<vmem>>, vector<1x16x128xf32>
    %3 = vector.shape_cast %2 : vector<1x16x128xf32> to vector<16x128xf32>
    %c0_5 = arith.constant 0 : index
    %c0_6 = arith.constant 0 : index
    %4 = vector.load %arg6[%c0_5, %c0_6] : memref<6x128xf32, #tpu.memory_space<vmem>>, vector<6x128xf32>
    %5 = vector.extract_strided_slice %4 {offsets = [0, 0], sizes = [1, 128], strides = [1, 1]} : vector<6x128xf32> to vector<1x128xf32>
    %6 = vector.extract_strided_slice %4 {offsets = [1, 0], sizes = [1, 128], strides = [1, 1]} : vector<6x128xf32> to vector<1x128xf32>
    %7 = vector.extract_strided_slice %4 {offsets = [2, 0], sizes = [1, 128], strides = [1, 1]} : vector<6x128xf32> to vector<1x128xf32>
    %8 = vector.extract_strided_slice %4 {offsets = [3, 0], sizes = [1, 128], strides = [1, 1]} : vector<6x128xf32> to vector<1x128xf32>
    %9 = vector.extract_strided_slice %4 {offsets = [4, 0], sizes = [1, 128], strides = [1, 1]} : vector<6x128xf32> to vector<1x128xf32>
    %10 = vector.extract_strided_slice %4 {offsets = [5, 0], sizes = [1, 128], strides = [1, 1]} : vector<6x128xf32> to vector<1x128xf32>
    %11 = arith.truncf %1 : vector<8x128xf32> to vector<8x128xbf16>
    %12 = arith.truncf %3 : vector<16x128xf32> to vector<16x128xbf16>
    %c0_7 = arith.constant 0 : index
    %c0_8 = arith.constant 0 : index
    %13 = vector.load %arg3[%c0_7, %c0_8] : memref<128x128xbf16, #tpu.memory_space<vmem>>, vector<128x128xbf16>
    %cst = arith.constant dense<0.000000e+00> : vector<8x128xf32>
    %14 = tpu.matmul %11, %13, %cst {dimension_numbers = #tpu.dot_dimension_numbers<[1], [0], [0], [1], [0, 0, 1, 1], [], []>} : vector<8x128xbf16>, vector<128x128xbf16>, vector<8x128xf32> -> vector<8x128xf32>
    %15 = vector.broadcast %5 : vector<1x128xf32> to vector<8x128xf32>
    %16 = arith.addf %14, %15 : vector<8x128xf32>
    %c0_9 = arith.constant 0 : index
    %c0_10 = arith.constant 0 : index
    %17 = vector.load %arg4[%c0_9, %c0_10] : memref<128x256xbf16, #tpu.memory_space<vmem>>, vector<128x256xbf16>
    %cst_11 = arith.constant dense<0.000000e+00> : vector<16x256xf32>
    %18 = tpu.matmul %12, %17, %cst_11 {dimension_numbers = #tpu.dot_dimension_numbers<[1], [0], [0], [1], [0, 0, 1, 1], [], []>} : vector<16x128xbf16>, vector<128x256xbf16>, vector<16x256xf32> -> vector<16x256xf32>
    %19 = vector.extract_strided_slice %18 {offsets = [0, 0], sizes = [16, 128], strides = [1, 1]} : vector<16x256xf32> to vector<16x128xf32>
    %20 = vector.broadcast %6 : vector<1x128xf32> to vector<16x128xf32>
    %21 = arith.addf %19, %20 : vector<16x128xf32>
    %22 = vector.extract_strided_slice %18 {offsets = [0, 128], sizes = [16, 128], strides = [1, 1]} : vector<16x256xf32> to vector<16x128xf32>
    %23 = vector.broadcast %7 : vector<1x128xf32> to vector<16x128xf32>
    %24 = arith.addf %22, %23 : vector<16x128xf32>
    %25 = arith.truncf %16 : vector<8x128xf32> to vector<8x128xbf16>
    %26 = arith.truncf %21 : vector<16x128xf32> to vector<16x128xbf16>
    %27 = arith.truncf %24 : vector<16x128xf32> to vector<16x128xbf16>
    %cst_12 = arith.constant 0.000000e+00 : f32
    %28 = vector.broadcast %cst_12 : f32 to vector<8x128xf32>
    %29 = vector.extract_strided_slice %25 {offsets = [0, 0], sizes = [8, 32], strides = [1, 1]} : vector<8x128xbf16> to vector<8x32xbf16>
    %30 = vector.extract_strided_slice %26 {offsets = [0, 0], sizes = [16, 32], strides = [1, 1]} : vector<16x128xbf16> to vector<16x32xbf16>
    %31 = vector.extract_strided_slice %27 {offsets = [0, 0], sizes = [16, 32], strides = [1, 1]} : vector<16x128xbf16> to vector<16x32xbf16>
    %cst_13 = arith.constant dense<0.000000e+00> : vector<8x16xf32>
    %32 = tpu.matmul %29, %30, %cst_13 {dimension_numbers = #tpu.dot_dimension_numbers<[1], [1], [0], [0], [0, 0, 1, 0], [], []>} : vector<8x32xbf16>, vector<16x32xbf16>, vector<8x16xf32> -> vector<8x16xf32>
    %cst_14 = arith.constant dense<0xFF800000> : vector<8xf32>
    %33 = vector.multi_reduction <maximumf>, %32, %cst_14 [1] : vector<8x16xf32> to vector<8xf32>
    %34 = vector.shape_cast %33 : vector<8xf32> to vector<8x1xf32>
    %35 = vector.broadcast %34 : vector<8x1xf32> to vector<8x16xf32>
    %36 = arith.subf %32, %35 : vector<8x16xf32>
    %37 = math.exp %36 : vector<8x16xf32>
    %cst_15 = arith.constant dense<0.000000e+00> : vector<8xf32>
    %38 = vector.multi_reduction <add>, %37, %cst_15 [1] : vector<8x16xf32> to vector<8xf32>
    %39 = vector.shape_cast %38 : vector<8xf32> to vector<8x1xf32>
    %40 = tpu.reciprocal %39 {approx = true} : vector<8x1xf32> -> vector<8x1xf32>
    %41 = vector.broadcast %40 : vector<8x1xf32> to vector<8x16xf32>
    %42 = arith.mulf %37, %41 : vector<8x16xf32>
    %43 = arith.truncf %42 : vector<8x16xf32> to vector<8x16xbf16>
    %cst_16 = arith.constant dense<0.000000e+00> : vector<8x32xf32>
    %44 = tpu.matmul %43, %31, %cst_16 {dimension_numbers = #tpu.dot_dimension_numbers<[1], [0], [0], [1], [0, 0, 1, 1], [], []>} : vector<8x16xbf16>, vector<16x32xbf16>, vector<8x32xf32> -> vector<8x32xf32>
    %45 = arith.truncf %44 : vector<8x32xf32> to vector<8x32xbf16>
    %c0_17 = arith.constant 0 : index
    %c0_18 = arith.constant 0 : index
    %46 = vector.load %arg5[%c0_17, %c0_18] : memref<128x128xbf16, #tpu.memory_space<vmem>>, vector<32x128xbf16>
    %cst_19 = arith.constant dense<0.000000e+00> : vector<8x128xf32>
    %47 = tpu.matmul %45, %46, %cst_19 {dimension_numbers = #tpu.dot_dimension_numbers<[1], [0], [0], [1], [0, 0, 1, 1], [], []>} : vector<8x32xbf16>, vector<32x128xbf16>, vector<8x128xf32> -> vector<8x128xf32>
    %48 = arith.addf %28, %47 : vector<8x128xf32>
    %49 = vector.extract_strided_slice %25 {offsets = [0, 32], sizes = [8, 32], strides = [1, 1]} : vector<8x128xbf16> to vector<8x32xbf16>
    %50 = vector.extract_strided_slice %26 {offsets = [0, 32], sizes = [16, 32], strides = [1, 1]} : vector<16x128xbf16> to vector<16x32xbf16>
    %51 = vector.extract_strided_slice %27 {offsets = [0, 32], sizes = [16, 32], strides = [1, 1]} : vector<16x128xbf16> to vector<16x32xbf16>
    %cst_20 = arith.constant dense<0.000000e+00> : vector<8x16xf32>
    %52 = tpu.matmul %49, %50, %cst_20 {dimension_numbers = #tpu.dot_dimension_numbers<[1], [1], [0], [0], [0, 0, 1, 0], [], []>} : vector<8x32xbf16>, vector<16x32xbf16>, vector<8x16xf32> -> vector<8x16xf32>
    %cst_21 = arith.constant dense<0xFF800000> : vector<8xf32>
    %53 = vector.multi_reduction <maximumf>, %52, %cst_21 [1] : vector<8x16xf32> to vector<8xf32>
    %54 = vector.shape_cast %53 : vector<8xf32> to vector<8x1xf32>
    %55 = vector.broadcast %54 : vector<8x1xf32> to vector<8x16xf32>
    %56 = arith.subf %52, %55 : vector<8x16xf32>
    %57 = math.exp %56 : vector<8x16xf32>
    %cst_22 = arith.constant dense<0.000000e+00> : vector<8xf32>
    %58 = vector.multi_reduction <add>, %57, %cst_22 [1] : vector<8x16xf32> to vector<8xf32>
    %59 = vector.shape_cast %58 : vector<8xf32> to vector<8x1xf32>
    %60 = tpu.reciprocal %59 {approx = true} : vector<8x1xf32> -> vector<8x1xf32>
    %61 = vector.broadcast %60 : vector<8x1xf32> to vector<8x16xf32>
    %62 = arith.mulf %57, %61 : vector<8x16xf32>
    %63 = arith.truncf %62 : vector<8x16xf32> to vector<8x16xbf16>
    %cst_23 = arith.constant dense<0.000000e+00> : vector<8x32xf32>
    %64 = tpu.matmul %63, %51, %cst_23 {dimension_numbers = #tpu.dot_dimension_numbers<[1], [0], [0], [1], [0, 0, 1, 1], [], []>} : vector<8x16xbf16>, vector<16x32xbf16>, vector<8x32xf32> -> vector<8x32xf32>
    %65 = arith.truncf %64 : vector<8x32xf32> to vector<8x32xbf16>
    %c32 = arith.constant 32 : index
    %c0_24 = arith.constant 0 : index
    %66 = vector.load %arg5[%c32, %c0_24] : memref<128x128xbf16, #tpu.memory_space<vmem>>, vector<32x128xbf16>
    %cst_25 = arith.constant dense<0.000000e+00> : vector<8x128xf32>
    %67 = tpu.matmul %65, %66, %cst_25 {dimension_numbers = #tpu.dot_dimension_numbers<[1], [0], [0], [1], [0, 0, 1, 1], [], []>} : vector<8x32xbf16>, vector<32x128xbf16>, vector<8x128xf32> -> vector<8x128xf32>
    %68 = arith.addf %48, %67 : vector<8x128xf32>
    %69 = vector.extract_strided_slice %25 {offsets = [0, 64], sizes = [8, 32], strides = [1, 1]} : vector<8x128xbf16> to vector<8x32xbf16>
    %70 = vector.extract_strided_slice %26 {offsets = [0, 64], sizes = [16, 32], strides = [1, 1]} : vector<16x128xbf16> to vector<16x32xbf16>
    %71 = vector.extract_strided_slice %27 {offsets = [0, 64], sizes = [16, 32], strides = [1, 1]} : vector<16x128xbf16> to vector<16x32xbf16>
    %cst_26 = arith.constant dense<0.000000e+00> : vector<8x16xf32>
    %72 = tpu.matmul %69, %70, %cst_26 {dimension_numbers = #tpu.dot_dimension_numbers<[1], [1], [0], [0], [0, 0, 1, 0], [], []>} : vector<8x32xbf16>, vector<16x32xbf16>, vector<8x16xf32> -> vector<8x16xf32>
    %cst_27 = arith.constant dense<0xFF800000> : vector<8xf32>
    %73 = vector.multi_reduction <maximumf>, %72, %cst_27 [1] : vector<8x16xf32> to vector<8xf32>
    %74 = vector.shape_cast %73 : vector<8xf32> to vector<8x1xf32>
    %75 = vector.broadcast %74 : vector<8x1xf32> to vector<8x16xf32>
    %76 = arith.subf %72, %75 : vector<8x16xf32>
    %77 = math.exp %76 : vector<8x16xf32>
    %cst_28 = arith.constant dense<0.000000e+00> : vector<8xf32>
    %78 = vector.multi_reduction <add>, %77, %cst_28 [1] : vector<8x16xf32> to vector<8xf32>
    %79 = vector.shape_cast %78 : vector<8xf32> to vector<8x1xf32>
    %80 = tpu.reciprocal %79 {approx = true} : vector<8x1xf32> -> vector<8x1xf32>
    %81 = vector.broadcast %80 : vector<8x1xf32> to vector<8x16xf32>
    %82 = arith.mulf %77, %81 : vector<8x16xf32>
    %83 = arith.truncf %82 : vector<8x16xf32> to vector<8x16xbf16>
    %cst_29 = arith.constant dense<0.000000e+00> : vector<8x32xf32>
    %84 = tpu.matmul %83, %71, %cst_29 {dimension_numbers = #tpu.dot_dimension_numbers<[1], [0], [0], [1], [0, 0, 1, 1], [], []>} : vector<8x16xbf16>, vector<16x32xbf16>, vector<8x32xf32> -> vector<8x32xf32>
    %85 = arith.truncf %84 : vector<8x32xf32> to vector<8x32xbf16>
    %c64 = arith.constant 64 : index
    %c0_30 = arith.constant 0 : index
    %86 = vector.load %arg5[%c64, %c0_30] : memref<128x128xbf16, #tpu.memory_space<vmem>>, vector<32x128xbf16>
    %cst_31 = arith.constant dense<0.000000e+00> : vector<8x128xf32>
    %87 = tpu.matmul %85, %86, %cst_31 {dimension_numbers = #tpu.dot_dimension_numbers<[1], [0], [0], [1], [0, 0, 1, 1], [], []>} : vector<8x32xbf16>, vector<32x128xbf16>, vector<8x128xf32> -> vector<8x128xf32>
    %88 = arith.addf %68, %87 : vector<8x128xf32>
    %89 = vector.extract_strided_slice %25 {offsets = [0, 96], sizes = [8, 32], strides = [1, 1]} : vector<8x128xbf16> to vector<8x32xbf16>
    %90 = vector.extract_strided_slice %26 {offsets = [0, 96], sizes = [16, 32], strides = [1, 1]} : vector<16x128xbf16> to vector<16x32xbf16>
    %91 = vector.extract_strided_slice %27 {offsets = [0, 96], sizes = [16, 32], strides = [1, 1]} : vector<16x128xbf16> to vector<16x32xbf16>
    %cst_32 = arith.constant dense<0.000000e+00> : vector<8x16xf32>
    %92 = tpu.matmul %89, %90, %cst_32 {dimension_numbers = #tpu.dot_dimension_numbers<[1], [1], [0], [0], [0, 0, 1, 0], [], []>} : vector<8x32xbf16>, vector<16x32xbf16>, vector<8x16xf32> -> vector<8x16xf32>
    %cst_33 = arith.constant dense<0xFF800000> : vector<8xf32>
    %93 = vector.multi_reduction <maximumf>, %92, %cst_33 [1] : vector<8x16xf32> to vector<8xf32>
    %94 = vector.shape_cast %93 : vector<8xf32> to vector<8x1xf32>
    %95 = vector.broadcast %94 : vector<8x1xf32> to vector<8x16xf32>
    %96 = arith.subf %92, %95 : vector<8x16xf32>
    %97 = math.exp %96 : vector<8x16xf32>
    %cst_34 = arith.constant dense<0.000000e+00> : vector<8xf32>
    %98 = vector.multi_reduction <add>, %97, %cst_34 [1] : vector<8x16xf32> to vector<8xf32>
    %99 = vector.shape_cast %98 : vector<8xf32> to vector<8x1xf32>
    %100 = tpu.reciprocal %99 {approx = true} : vector<8x1xf32> -> vector<8x1xf32>
    %101 = vector.broadcast %100 : vector<8x1xf32> to vector<8x16xf32>
    %102 = arith.mulf %97, %101 : vector<8x16xf32>
    %103 = arith.truncf %102 : vector<8x16xf32> to vector<8x16xbf16>
    %cst_35 = arith.constant dense<0.000000e+00> : vector<8x32xf32>
    %104 = tpu.matmul %103, %91, %cst_35 {dimension_numbers = #tpu.dot_dimension_numbers<[1], [0], [0], [1], [0, 0, 1, 1], [], []>} : vector<8x16xbf16>, vector<16x32xbf16>, vector<8x32xf32> -> vector<8x32xf32>
    %105 = arith.truncf %104 : vector<8x32xf32> to vector<8x32xbf16>
    %c96 = arith.constant 96 : index
    %c0_36 = arith.constant 0 : index
    %106 = vector.load %arg5[%c96, %c0_36] : memref<128x128xbf16, #tpu.memory_space<vmem>>, vector<32x128xbf16>
    %cst_37 = arith.constant dense<0.000000e+00> : vector<8x128xf32>
    %107 = tpu.matmul %105, %106, %cst_37 {dimension_numbers = #tpu.dot_dimension_numbers<[1], [0], [0], [1], [0, 0, 1, 1], [], []>} : vector<8x32xbf16>, vector<32x128xbf16>, vector<8x128xf32> -> vector<8x128xf32>
    %108 = arith.addf %88, %107 : vector<8x128xf32>
    %109 = vector.broadcast %8 : vector<1x128xf32> to vector<8x128xf32>
    %110 = arith.addf %108, %109 : vector<8x128xf32>
    %111 = arith.addf %1, %110 : vector<8x128xf32>
    %cst_38 = arith.constant dense<0.000000e+00> : vector<8xf32>
    %112 = vector.multi_reduction <add>, %111, %cst_38 [1] : vector<8x128xf32> to vector<8xf32>
    %113 = vector.shape_cast %112 : vector<8xf32> to vector<8x1xf32>
    %cst_39 = arith.constant 1.280000e+02 : f32
    %114 = vector.broadcast %cst_39 : f32 to vector<8x1xf32>
    %115 = arith.divf %113, %114 : vector<8x1xf32>
    %116 = arith.mulf %111, %111 : vector<8x128xf32>
    %cst_40 = arith.constant dense<0.000000e+00> : vector<8xf32>
    %117 = vector.multi_reduction <add>, %116, %cst_40 [1] : vector<8x128xf32> to vector<8xf32>
    %118 = vector.shape_cast %117 : vector<8xf32> to vector<8x1xf32>
    %cst_41 = arith.constant 1.280000e+02 : f32
    %119 = vector.broadcast %cst_41 : f32 to vector<8x1xf32>
    %120 = arith.divf %118, %119 : vector<8x1xf32>
    %121 = arith.mulf %115, %115 : vector<8x1xf32>
    %122 = arith.subf %120, %121 : vector<8x1xf32>
    %cst_42 = arith.constant 9.99999974E-6 : f32
    %123 = vector.broadcast %cst_42 : f32 to vector<8x1xf32>
    %124 = arith.addf %122, %123 : vector<8x1xf32>
    %125 = math.rsqrt %124 : vector<8x1xf32>
    %126 = vector.broadcast %115 : vector<8x1xf32> to vector<8x128xf32>
    %127 = arith.subf %111, %126 : vector<8x128xf32>
    %128 = vector.broadcast %125 : vector<8x1xf32> to vector<8x128xf32>
    %129 = vector.broadcast %9 : vector<1x128xf32> to vector<8x128xf32>
    %130 = arith.mulf %128, %129 : vector<8x128xf32>
    %131 = arith.mulf %127, %130 : vector<8x128xf32>
    %132 = vector.broadcast %10 : vector<1x128xf32> to vector<8x128xf32>
    %133 = arith.addf %131, %132 : vector<8x128xf32>
    %c0_43 = arith.constant 0 : index
    %c0_44 = arith.constant 0 : index
    %c0_45 = arith.constant 0 : index
    %134 = vector.load %arg7[%c0_43, %c0_44, %c0_45] : memref<1x8x128xf32, #tpu.memory_space<vmem>>, vector<1x8x128xf32>
    %135 = vector.shape_cast %134 : vector<1x8x128xf32> to vector<8x128xf32>
    %136 = vector.shape_cast %133 : vector<8x128xf32> to vector<1x8x128xf32>
    tpu.vector_store %arg7[%c0_43, %c0_44, %c0_45], %136 {strides = array<i32>} : memref<1x8x128xf32, #tpu.memory_space<vmem>>, vector<1x8x128xf32>,
    return
  }
  func.func @transform_0(%arg0: i32) -> (i32, i32, i32) {
    %c0_i32 = arith.constant 0 : i32
    %c0_i32_0 = arith.constant 0 : i32
    %c0_i32_1 = arith.constant 0 : i32
    return %arg0, %c0_i32, %c0_i32_0 : i32, i32, i32
  }
  func.func @transform_1(%arg0: i32) -> (i32, i32, i32) {
    %c0_i32 = arith.constant 0 : i32
    %c0_i32_0 = arith.constant 0 : i32
    %c0_i32_1 = arith.constant 0 : i32
    return %arg0, %c0_i32, %c0_i32_0 : i32, i32, i32
  }
  func.func @transform_2(%arg0: i32) -> (i32, i32) {
    %c0_i32 = arith.constant 0 : i32
    %c0_i32_0 = arith.constant 0 : i32
    %c0_i32_1 = arith.constant 0 : i32
    return %c0_i32, %c0_i32_0 : i32, i32
  }
  func.func @transform_3(%arg0: i32) -> (i32, i32) {
    %c0_i32 = arith.constant 0 : i32
    %c0_i32_0 = arith.constant 0 : i32
    %c0_i32_1 = arith.constant 0 : i32
    return %c0_i32, %c0_i32_0 : i32, i32
  }
  func.func @transform_4(%arg0: i32) -> (i32, i32) {
    %c0_i32 = arith.constant 0 : i32
    %c0_i32_0 = arith.constant 0 : i32
    %c0_i32_1 = arith.constant 0 : i32
    return %c0_i32, %c0_i32_0 : i32, i32
  }
  func.func @transform_5(%arg0: i32) -> (i32, i32) {
    %c0_i32 = arith.constant 0 : i32
    %c0_i32_0 = arith.constant 0 : i32
    %c0_i32_1 = arith.constant 0 : i32
    return %c0_i32, %c0_i32_0 : i32, i32
  }
  func.func @transform_6(%arg0: i32) -> (i32, i32, i32) {
    %c0_i32 = arith.constant 0 : i32
    %c0_i32_0 = arith.constant 0 : i32
    %c0_i32_1 = arith.constant 0 : i32
    return %arg0, %c0_i32, %c0_i32_0 : i32, i32, i32
  }
}

</mosaic_0001>

<bundles_post_ra>
// kernel: cross_attention.1
= control target key start
LH: loop header
LB: loop body
LE: loop exit
PB: predicated region body
PF: predicated region fallthrough
CT: control target
= control target key end

     0   :  { %11 = vsyncpa [#allocation3], 0  ;;  %s2055_s0 = inlined_call_operand.vmem [shape: f32[2,8,128], index: 0, kind: input, shape index: {}]   ;;  %s2056_s1 = inlined_call_operand.vmem [shape: f32[2,16,128], index: 1, kind: input, shape index: {}]   ;;  %s2057_s2 = inlined_call_operand.vmem [shape: bf16[128,128], index: 2, kind: input, shape index: {}]   ;;  %s2058_s3 = inlined_call_operand.vmem [shape: bf16[128,256], index: 3, kind: input, shape index: {}]   ;;  %s2059_s4 = inlined_call_operand.vmem [shape: bf16[128,128], index: 4, kind: input, shape index: {}]   ;;  %s2060_s5 = inlined_call_operand.vmem [shape: f32[6,128], index: 5, kind: input, shape index: {}]   ;;  %s2061_s6 = inlined_call_operand.hbm [shape: f32[2,8,128], index: 6, kind: output, shape index: {}]  }
   0x1   :  { %13 = vsyncpa [#allocation3 + $0x1], 0  ;;  %s1727_s21 = smov 0   ;;  %s1729_s22 = smov 0  }
   0x2   :  { %s1731_s23 = smov 0   ;;  %s1733_s24 = smov 0  }
   0x3 LB: > { %s1748_s25 = sadd.s32 4294967295, %s1683_s24   ;;  %s1324_s26 = sadd.s32 4294967294, %s1683_s24   ;;  %s1683_s24 = sphi %s1733_s24, %s2067_s24   ;;  %s1679_s23 = sphi %s1731_s23, %s2066_s23   ;;  %s1675_s22 = sphi %s1729_s22, %s2065_s22   ;;  %s1671_s21 = sphi %s1727_s21, %s2064_s21  }
   0x4   : > { %s1752_s27 = sadd.s32 1, %s1683_s24   ;;  %s162_s28 = sadd.s32 1, %s1679_s23 }
   0x5   : > { %s159_s29 = ssub.s32 %s1683_s24, %s1752_s27  ;;  %p172_p0 = scmp.ne.s32.totalorder %s1679_s23, %s1675_s22 }
   0x6   : > { %p160_p1 = scmp.eq.s32.totalorder %s159_s29, 0  ;;  %p173_p2 = scmp.eq.s32.totalorder %s1748_s25, 1 }
   0x7   : > { %p178_p3 = scmp.ne.s32.totalorder %s1675_s22, %s1671_s21  ;;  %p179_p4 = scmp.eq.s32.totalorder %s1324_s26, 1 }
   0x8   : > { %s1763_s30 = scalar_select %p160_p1, %s1679_s23, %s162_s28  }
   0x9   : > { %p1765_p5 = por %p173_p2, %p172_p0  ;;  %p1769_p6 = por %p179_p4, %p178_p3 }
   0xa   : > { %p1327_p7 = scmp.ge.s32.totalorder %s1683_s24, 1  ;;  %p224_p8 = scmp.lt.s32.totalorder %s1683_s24, 3 }
   0xc   : > { %p225_p9 = pnand %p1327_p7, %p224_p8 }
   0xd   : > { %v1563_v0 = vld [vmem:[%s2058_s3 + $0x4] ss:$8 sps:$4 sm:$0xff] (!%p225_p9)   ;;  %v1565_v1 = vld [vmem:[%s2058_s3] ss:$8 sps:$4 sm:$0xff] (!%p225_p9)   ;;  %v1685_v2 = vmov (!%p225_p9), 0.0   ;;  %v1686_v3 = vmov (!%p225_p9), 0   ;;  %v290_v31 = vlaneseq (!%p225_p9) }
   0xe   : > { %228 = sbr.rel (%p225_p9) target bundleno = 2815 (0xaff), region = 44  ;;  %1418 = vmatprep.subr.bf16.mxu0 (!%p225_p9), %v1685_v2  ;;  %510 = vmatprep.mubr.bf16.mxu1 (!%p225_p9), %v1686_v3  ;;  %v1566_v4 = vld [vmem:[%s2058_s3 + $0x14] ss:$8 sps:$4 sm:$0xff] (!%p225_p9)   ;;  %vm1687_vm0 = vmmov (!%p225_p9), 0   ;;  %v1568_v5 = vld [vmem:[%s2058_s3 + $0x10] ss:$8 sps:$4 sm:$0xff] (!%p225_p9)  }
   0xf   : > { %478 = vmatprep.subr.bf16.mxu1 (!%p225_p9), %v1563_v0  ;;  %1434 = vmatprep.mubr.msk.bf16.mxu0 (!%p225_p9), %vm1687_vm0, %v1685_v2  ;;  %v1569_v6 = vld [vmem:[%s2058_s3 + $0x24] ss:$8 sps:$4 sm:$0xff] (!%p225_p9)   ;;  %v1572_v9 = vld [vmem:[%s2058_s3 + $0x20] ss:$8 sps:$4 sm:$0xff] (!%p225_p9)   ;;  %v1573_v10 = vld [vmem:[%s2058_s3 + $0x34] ss:$8 sps:$4 sm:$0xff] (!%p225_p9)  }
  0x10   : > { %479 = vmatpush1.bf16.msra.mxu1 (!%p225_p9), %v1565_v1  ;;  %v1571_v7 = vld [vmem:[%s2057_s2] sm:$0xff] (!%p225_p9)   ;;  %v1575_v8 = vld [vmem:[%s2057_s2 + $0x8] sm:$0xff] (!%p225_p9)   ;;  %v1579_v11 = vld [vmem:[%s2057_s2 + $0x10] sm:$0xff] (!%p225_p9)   ;;  %p258_p10 = scmp.lt.s32.totalorder (!%p225_p9), %s1748_s25, 1  ;;  %v1879_v32 = vshrl.u32 (!%p225_p9), %v290_v31, 7  ;;  %vm536_vm1 = vcmask (!%p225_p9), 261120  }
  0x11   : > { %480 = vmatprep.subr.bf16.mxu1 (!%p225_p9), %v1566_v4  ;;  %1419 = vmatpush3.bf16.msra.mxu0 (!%p225_p9), %v1571_v7  ;;  %v1576_v12 = vld [vmem:[%s2058_s3 + $0x30] ss:$8 sps:$4 sm:$0xff] (!%p225_p9)   ;;  %v1577_v13 = vld [vmem:[%s2058_s3 + $0x44] ss:$8 sps:$4 sm:$0xff] (!%p225_p9)   ;;  %v1580_v15 = vld [vmem:[%s2058_s3 + $0x40] ss:$8 sps:$4 sm:$0xff] (!%p225_p9)  }
  0x12   : > { %1420 = vmatprep.subr.bf16.mxu0 (!%p225_p9), %v1685_v2  ;;  %v1583_v14 = vld [vmem:[%s2057_s2 + $0x18] sm:$0xff] (!%p225_p9)   ;;  %v1587_v17 = vld [vmem:[%s2057_s2 + $0x20] sm:$0xff] (!%p225_p9)   ;;  %v1591_v20 = vld [vmem:[%s2057_s2 + $0x28] sm:$0xff] (!%p225_p9)   ;;  %v523_v33 = vsub.s32 (!%p225_p9), 1, %v1879_v32  ;;  %v529_v35 = vsub.s32 (!%p225_p9), 2, %v1879_v32  ;;  %v292_v36 = vsub.s32 (!%p225_p9), 0, %v1879_v32 }
  0x13   : > { %v1581_v16 = vld [vmem:[%s2058_s3 + $0x54] ss:$8 sps:$4 sm:$0xff] (!%p225_p9)   ;;  %v1584_v18 = vld [vmem:[%s2058_s3 + $0x50] ss:$8 sps:$4 sm:$0xff] (!%p225_p9)   ;;  %v1585_v19 = vld [vmem:[%s2058_s3 + $0x64] ss:$8 sps:$4 sm:$0xff] (!%p225_p9)  }
  0x14   : > { %481 = vmatpush1.bf16.msra.mxu1 (!%p225_p9), %v1568_v5  ;;  %v1588_v21 = vld [vmem:[%s2058_s3 + $0x60] ss:$8 sps:$4 sm:$0xff] (!%p225_p9)   ;;  %v1589_v22 = vld [vmem:[%s2058_s3 + $0x74] ss:$8 sps:$4 sm:$0xff] (!%p225_p9)   ;;  %v1592_v24 = vld [vmem:[%s2058_s3 + $0x70] ss:$8 sps:$4 sm:$0xff] (!%p225_p9)  }
  0x15   : > { %482 = vmatprep.subr.bf16.mxu1 %v1569_v6  ;;  %1421 = vmatpush3.bf16.msra.mxu0 %v1575_v8  ;;  %s1821_s20 = scalar_select %p258_p10, %s1748_s25, 1  ;;  %v1593_v23 = vld [vmem:[%s2057_s2 + $0x30] sm:$0xff]   ;;  %v1594_v28 = vld [vmem:[%s2057_s2 + $0x38] sm:$0xff]   ;;  %v1885_v34 = vld [vmem:[%s2060_s5] sm:$0x3f]  ;;  %vm583_vm2 = vcmask 130048  }
  0x16   : > { %1422 = vmatprep.subr.bf16.mxu0 %v1685_v2  ;;  %v524_v37 = vrot.slane %v1885_v34, %v523_v33  ;;  %v530_v39 = vrot.slane %v1885_v34, %v529_v35  ;;  %v293_v40 = vrot.slane %v1885_v34, %v292_v36  ;;  %s1688_s9 = smov 96   ;;  %s1689_s10 = smov 64  }
  0x17   : > { %s1380_s16 = sshll.u32 %s1821_s20, 4  ;;  %s1329_s17 = sshll.u32 %s1821_s20, 3 }
  0x18   : > { %483 = vmatpush1.bf16.msra.mxu1 %v1572_v9  ;;  %s266_s11 = scalar_lea.vmem %s2056_s1, %s1380_s16  ;;  %s261_s26 = scalar_lea.vmem %s2055_s0, %s1329_s17 }
  0x19   : > { %484 = vmatprep.subr.bf16.mxu1 %v1573_v10  ;;  %1423 = vmatpush3.bf16.msra.mxu0 %v1579_v11  ;;  %v269_v25 = vld [vmem:[%s266_s11] sm:$0xff]  ;;  %v270_v26 = vld [vmem:[%s266_s11 + $0x8] sm:$0xff]  ;;  %s255_s12 = sand.u32 1, %s1675_s22   ;;  %s1377_s14 = sshll.u32 %s1748_s25, 7 }
  0x1a   : > { %1424 = vmatprep.subr.bf16.mxu0 %v1685_v2  ;;  %v273_v27 = vpack.c.bf16 %v270_v26, %v269_v25  ;;  %v1868_v29 = vld [vmem:[%s261_s26] sm:$0xff]  ;;  %s1690_s26 = smov 32   ;;  %s1328_s13 = sshll.u32 %s255_s12, 3 }
  0x1b   : > { %v272_v30 = vpack.c.bf16 %v1868_v29, %v1868_v29  ;;  %s257_s15 = scalar_lea.vmem [#allocation2], %s1328_s13  ;;  %s2013_s16 = scalar_lea.hbm %s2061_s6, %s1377_s14 }
  0x1c   : > { %485 = vmatpush1.bf16.msra.mxu1 %v1576_v12  ;;  %s1253_s18 = sshll.u32 %s257_s15, 4  ;;  %s1240_s28 = scalar_lea.sflag [#allocation3], %s255_s12  ;;  %s2015_s18 = int_to_ptr.vmem [resolvable:$true] %s1253_s18 }
  0x1d   : > { %486 = vmatprep.subr.bf16.mxu1 %v1577_v13  ;;  %1425 = vmatpush3.bf16.msra.mxu0 %v1583_v14  ;;  %s1621_s17 = scalar_lea.vmem %s2015_s18, 128  ;;  %s1691_s25 = smov [#allocation2]  }
  0x1e   : > { %1426 = vmatprep.subr.bf16.mxu0 %v1685_v2  ;;  %p1622_p11 = scmp.ne.s32.totalorder %s2015_s18, %s1621_s17  ;;  %s1625_s29 = sshll.u32 %s1691_s25, 4  ;;  %s1626_s29 = int_to_ptr.vmem [resolvable:$false] %s1625_s29 }
  0x1f   : > { %p1628_p0 = scmp.lt.s32.totalorder %s2015_s18, %s1626_s29 }
  0x20   : > { %487 = vmatpush1.bf16.msra.mxu1 %v1580_v15  ;;  %p1623_p12 = pnand %p1622_p11, %p1765_p5 }
  0x21   : > { %488 = vmatprep.subr.bf16.mxu1 %v1581_v16  ;;  %1427 = vmatpush3.bf16.msra.mxu0 %v1587_v17 }
  0x22   : > { %1428 = vmatprep.subr.bf16.mxu0 %v1685_v2  ;;  %p1624_p13 = pneg %p1623_p12 }
  0x24   : > { %489 = vmatpush1.bf16.msra.mxu1 %v1584_v18 }
  0x25   : > { %490 = vmatprep.subr.bf16.mxu1 %v1585_v19  ;;  %1429 = vmatpush3.bf16.msra.mxu0 %v1591_v20 }
  0x26   : > { %1430 = vmatprep.subr.bf16.mxu0 %v1685_v2 }
  0x28   : > { %491 = vmatpush1.bf16.msra.mxu1 %v1588_v21  ;;  %v1597_v21 = vld [vmem:[%s2059_s4 + $0x10] sm:$0xff]  }
  0x29   : > { %492 = vmatprep.subr.bf16.mxu1 %v1589_v22  ;;  %1431 = vmatpush3.bf16.msra.mxu0 %v1593_v23  ;;  %v1598_v22 = vld [vmem:[%s2059_s4 + $0x18] sm:$0xff]  }
  0x2a   : > { %1432 = vmatprep.subr.bf16.mxu0 %v1685_v2 }
  0x2c   : > { %493 = vmatpush1.bf16.msra.mxu1 %v1592_v24 }
  0x2d   : > { %1444 = vmatprep.subr.bf16.mxu1 %v1685_v2  ;;  %1433 = vmatpush3.bf16.msra.mxu0 %v1594_v28 }
  0x2e   : > { %1438 = vmatprep.subr.bf16.mxu0 %v1685_v2 }
  0x2f   : > { %511 = vmatmul.mubr.bf16.vlgmr.msra.gmra.mrb[0].mxu1 %v273_v27  ;;  %v1595_v27 = vld [vmem:[%s2059_s4] sm:$0xff]  }
  0x30   : > { %1446 = vmatprep.mubr.msk.bf16.mxu1 %vm1687_vm0, %v1685_v2  ;;  %1435 = vmatmul.mubr.bf16.vlgmr.msra.gmra.mrb[0].mxu0 %v272_v30  ;;  %v1596_v30 = vld [vmem:[%s2059_s4 + $0x8] sm:$0xff]  }
  0x31   : > { %1440 = vmatprep.mubr.msk.bf16.mxu0 %vm1687_vm0, %v1685_v2 }
 0x102   : > { %v512_v38 = vpop.f32.mrb[0].mxu1 }
 0x103   : > { %v514_v41 = vpop.f32.mrb[1].mxu1  ;;  %v525_v43 = vadd.f32 %v524_v37, %v512_v38  ;;  %v376_v46 = vpop.f32.mrb[0].mxu0 }
 0x104   : > { %v516_v42 = vpop.f32.mrb[2].mxu1  ;;  %v531_v47 = vadd.f32 %v530_v39, %v514_v41  ;;  %v377_v49 = vadd.f32 %v376_v46, %v293_v40  ;;  %v1436_v50 = vpop.f32.mrb[1].mxu0 }
 0x105   : > { %v526_v44 = vadd.f32 %v524_v37, %v516_v42  ;;  %v518_v45 = vpop.f32.mrb[3].mxu1  ;;  %v379_v52 = vpop.f32.mrb[2].mxu0 }
 0x106   : > { %v532_v48 = vadd.f32 %v530_v39, %v518_v45  ;;  %v1437_v54 = vpop.f32.mrb[3].mxu0  ;;  %v1898_v55 = vpack.c.bf16 %v377_v49, %v377_v49 }
 0x107   : > { %v1892_v51 = vpack.c.bf16 %v526_v44, %v525_v43 }
 0x108   : > { %v1894_v53 = vpack.c.bf16 %v532_v48, %v531_v47 }
 0x109   : > { %648 = vrot.lane.b32.xlu0 %v1892_v51, %s1688_s9  ;;  %v541_v56 = vsel %vm536_vm1, %v1892_v51, 0 }
 0x10a   : > { %1439 = vmatpush3.bf16.xpose.msra.mxu0 %v541_v56  ;;  %1445 = vmatpush3.bf16.msra.mxu1 %v1894_v53 }
 0x10b   : > { %1450 = vmatprep.subr.bf16.mxu0 %v1685_v2  ;;  %1456 = vmatprep.subr.bf16.mxu1 %v1685_v2 }
 0x10d   : > { %645 = vrot.lane.b32.xlu0 %v1898_v55, %s1688_s9 }
 0x111   : > { %1441 = vmatmul.mubr.msk.bf16.vlgmr.msra.gmra.mrb[4].mxu0 %vm536_vm1, %v1898_v55 }
 0x112   : > { %1452 = vmatprep.mubr.msk.bf16.mxu0 %vm1687_vm0, %v1685_v2 }
 0x17b   : > { %v649_v57 = vpop.permute.xlu0 %648 }
 0x17c   : > { %v654_v58 = vsel %vm536_vm1, %v649_v57, 0 }
 0x17d   : > { %1451 = vmatpush3.bf16.xpose.msra.mxu0 %v654_v58 }
 0x17e   : > { %1462 = vmatprep.subr.bf16.mxu0 %v1685_v2 }
 0x17f   : > { %v646_v59 = vpop.permute.xlu0 %645 }
 0x184   : > { %1453 = vmatmul.mubr.msk.bf16.vlgmr.msra.gmra.mrb[8].mxu0 %vm536_vm1, %v646_v59 }
 0x185   : > { %1466 = vmatprep.mubr.msk.bf16.mxu0 %vm1687_vm0, %v1685_v2  ;;  %1463 = vmatpush3.bf16.msra.mxu0 %v1597_v21 }
 0x186   : > { %1464 = vmatprep.subr.bf16.mxu0 %v1685_v2 }
 0x189   : > { %1465 = vmatpush3.bf16.msra.mxu0 %v1598_v22 }
 0x18a   : > { %1478 = vmatprep.subr.bf16.mxu0 %v1685_v2 }
 0x1e4   : > { %v577_v60 = vpop.f32.mrb[4].mxu0 }
 0x1e5   : > { %v1442_v61 = vpop.f32.mrb[5].mxu0  ;;  %v584_v62 = vsel %vm583_vm2, %v577_v60, -inf }
 0x1e6   : > { %585 = vmax.xlane.f32.xlu1 %v584_v62  ;;  %v580_v63 = vpop.f32.mrb[6].mxu0 }
 0x1e7   : > { %v1443_v0 = vpop.f32.mrb[7].mxu0 }
 0x257   : > { %v690_v1 = vpop.f32.mrb[8].mxu0 }
 0x258   : > { %v1454_v3 = vpop.f32.mrb[9].mxu0  ;;  %v696_v4 = vsel %vm583_vm2, %v690_v1, -inf }
 0x259   : > { %697 = vmax.xlane.f32.xlu1 %v696_v4  ;;  %v693_v5 = vpop.f32.mrb[10].mxu0 }
 0x25a   : > { %v1455_v6 = vpop.f32.mrb[11].mxu0 }
 0x25b   : > { %v1599_v6 = vld [vmem:[%s2059_s4 + $0x20] sm:$0xff]  }
 0x273   : > { %v586_v7 = vpop.xlane.xlu1 %585 }
 0x274   : > { %v587_v8 = vsub.f32 %v577_v60, %v586_v7 }
 0x276   : > { %v588_v9 = vmul.f32 1.442695, %v587_v8 }
 0x278   : > { %1603 = vpow2.f32 %v588_v9 }
 0x282   : > { %v1604_v10 = vpop.eup %1603 }
 0x283   : > { %v590_v11 = vsel %vm583_vm2, %v1604_v10, 0.0 }
 0x284   : > { %591 = vadd.xlane.f32.xlu0 %v590_v11 }
 0x29a   : > { %932 = vrot.lane.b32.xlu0 %v1894_v53, %s1689_s10 }
 0x2e6   : > { %v698_v12 = vpop.xlane.xlu1 %697 }
 0x2e7   : > { %v699_v13 = vsub.f32 %v690_v1, %v698_v12 }
 0x2e9   : > { %v700_v14 = vmul.f32 1.442695, %v699_v13 }
 0x2eb   : > { %1605 = vpow2.f32 %v700_v14 }
 0x2f5   : > { %v1606_v15 = vpop.eup %1605 }
 0x2f6   : > { %v702_v16 = vsel %vm583_vm2, %v1606_v15, 0.0 }
 0x2f7   : > { %703 = vadd.xlane.f32.xlu1 %v702_v16 }
 0x308   : > { %709 = vrot.lane.b32.xlu1 %v1894_v53, %s1688_s9  ;;  %s1627_s9 = scalar_lea.vmem %s1626_s29, 256 }
 0x309   : > { %p1629_p1 = scmp.lt.s32.totalorder %s1627_s9, %s1621_s17 }
 0x30b   : > { %p1630_p2 = por %p1629_p1, %p1628_p0 }
 0x30c   : > { %872 = vrot.lane.b32.xlu1 %v1892_v51, %s1689_s10 }
 0x30d   : > { %p1631_p3 = pnand %p1630_p2, %p1624_p13 }
 0x310   : > { %870 = vrot.lane.b32.xlu1 %v1898_v55, %s1689_s10 }
 0x311   : > { %v592_v17 = vpop.xlane.xlu0 %591 }
 0x312   : > { %1607 = vrcp.f32 %v592_v17 }
 0x315   : > { %v933_v37 = vpop.permute.xlu0 %932 }
 0x31c   : > { %v1608_v18 = vpop.eup %1607 }
 0x31d   : > { %v594_v19 = vmul.f32 %v1608_v18, %v1604_v10 }
 0x31f   : > { %v595_v20 = vpack.c.bf16 %v594_v19, %v594_v19 }
 0x321   : > { %1447 = vmatmul.mubr.msk.bf16.vlgmr.msra.gmra.mrb[4].mxu1 %vm583_vm2, %v595_v20 }
 0x322   : > { %1458 = vmatprep.mubr.msk.bf16.mxu1 %vm1687_vm0, %v1685_v2 }
 0x384   : > { %v704_v23 = vpop.xlane.xlu1 %703 }
 0x385   : > { %1609 = vrcp.f32 %v704_v23 }
 0x388   : > { %v710_v24 = vpop.permute.xlu1 %709 }
 0x389   : > { %1457 = vmatpush3.bf16.msra.mxu1 %v710_v24 }
 0x38a   : > { %1470 = vmatprep.subr.bf16.mxu1 %v1685_v2 }
 0x38c   : > { %v873_v39 = vpop.permute.xlu1 %872 }
 0x38d   : > { %v878_v44 = vsel %vm536_vm1, %v873_v39, 0 }
 0x38f   : > { %v1610_v25 = vpop.eup %1609 }
 0x390   : > { %v706_v26 = vmul.f32 %v1610_v25, %v1606_v15  ;;  %v871_v46 = vpop.permute.xlu1 %870 }
 0x392   : > { %v707_v28 = vpack.c.bf16 %v706_v26, %v706_v26 }
 0x394   : > { %1459 = vmatmul.mubr.msk.bf16.vlgmr.msra.gmra.mrb[8].mxu1 %vm583_vm2, %v707_v28  ;;  %v1601_v28 = vld [vmem:[%s2059_s4 + $0x30] sm:$0xff]  }
 0x395   : > { %1471 = vmatpush3.bf16.msra.mxu1 %v1595_v27  ;;  %1474 = vmatprep.mubr.msk.bf16.mxu1 %vm1687_vm0, %v1685_v2 }
 0x396   : > { %1472 = vmatprep.subr.bf16.mxu1 %v1685_v2 }
 0x399   : > { %1473 = vmatpush3.bf16.msra.mxu1 %v1596_v30 }
 0x39a   : > { %1484 = vmatprep.subr.bf16.mxu1 %v1685_v2 }
 0x3f4   : > { %v633_v31 = vpop.f32.mrb[4].mxu1 }
 0x3f5   : > { %v639_v33 = vpack.c.bf16 %v633_v31, %v633_v31  ;;  %v1448_v35 = vpop.f32.mrb[5].mxu1 }
 0x3f6   : > { %v636_v36 = vpop.f32.mrb[6].mxu1 }
 0x3f7   : > { %v1449_v38 = vpop.f32.mrb[7].mxu1  ;;  %1475 = vmatmul.mubr.msk.bf16.vlgmr.msra.gmra.mrb[12].mxu1 %vm536_vm1, %v639_v33 }
 0x3f8   : > { %1485 = vmatpush3.bf16.msra.mxu1 %v933_v37  ;;  %1486 = vmatprep.mubr.msk.bf16.mxu1 %vm1687_vm0, %v1685_v2 }
 0x3f9   : > { %1498 = vmatprep.subr.bf16.mxu1 %v1685_v2 }
 0x467   : > { %v749_v40 = vpop.f32.mrb[8].mxu1 }
 0x468   : > { %v755_v41 = vpack.c.bf16 %v749_v40, %v749_v40  ;;  %v1460_v42 = vpop.f32.mrb[9].mxu1 }
 0x469   : > { %v752_v43 = vpop.f32.mrb[10].mxu1 }
 0x46a   : > { %v1461_v45 = vpop.f32.mrb[11].mxu1  ;;  %1467 = vmatmul.mubr.msk.bf16.vlgmr.msra.gmra.mrb[12].mxu0 %vm536_vm1, %v755_v41  ;;  %v1602_v41 = vld [vmem:[%s2059_s4 + $0x38] sm:$0xff]  }
 0x46b   : > { %1479 = vmatpush3.bf16.xpose.msra.mxu0 %v878_v44  ;;  %1480 = vmatprep.mubr.msk.bf16.mxu0 %vm1687_vm0, %v1685_v2 }
 0x46c   : > { %1490 = vmatprep.subr.bf16.mxu0 %v1685_v2 }
 0x472   : > { %1481 = vmatmul.mubr.msk.bf16.vlgmr.msra.gmra.mrb[16].mxu0 %vm536_vm1, %v871_v46  ;;  %v1210_v46 = vsub.s32 3, %v1879_v32 }
 0x473   : > { %1494 = vmatprep.mubr.msk.bf16.mxu0 %vm1687_vm0, %v1685_v2  ;;  %1491 = vmatpush3.bf16.msra.mxu0 %v1599_v6 }
 0x474   : > { %1492 = vmatprep.subr.bf16.mxu0 %v1685_v2 }
 0x4ca   : > { %v864_v47 = vpop.f32.mrb[12].mxu1 }
 0x4cb   : > { %v1476_v48 = vpop.f32.mrb[13].mxu1 }
 0x4cc   : > { %v867_v49 = vpop.f32.mrb[14].mxu1 }
 0x4cd   : > { %v1477_v50 = vpop.f32.mrb[15].mxu1 }
 0x53d   : > { %v809_v52 = vpop.f32.mrb[12].mxu0 }
 0x53e   : > { %v1960_v54 = vadd.f32 %v864_v47, %v809_v52  ;;  %v1468_v56 = vpop.f32.mrb[13].mxu0  ;;  %v1211_v47 = vrot.slane %v1885_v34, %v1210_v46 }
 0x53f   : > { %v812_v57 = vpop.f32.mrb[14].mxu0 }
 0x540   : > { %v1469_v58 = vpop.f32.mrb[15].mxu0 }
 0x545   : > { %v914_v59 = vpop.f32.mrb[16].mxu0 }
 0x546   : > { %v1482_v60 = vpop.f32.mrb[17].mxu0  ;;  %v920_v61 = vsel %vm583_vm2, %v914_v59, -inf }
 0x547   : > { %921 = vmax.xlane.f32.xlu1 %v920_v61  ;;  %v917_v62 = vpop.f32.mrb[18].mxu0 }
 0x548   : > { %v1483_v63 = vpop.f32.mrb[19].mxu0 }
 0x5d4   : > { %v922_v0 = vpop.xlane.xlu1 %921 }
 0x5d5   : > { %v923_v1 = vsub.f32 %v914_v59, %v922_v0 }
 0x5d7   : > { %v924_v3 = vmul.f32 1.442695, %v923_v1 }
 0x5d9   : > { %1611 = vpow2.f32 %v924_v3  ;;  %v1229_v3 = vsub.s32 4, %v1879_v32 }
 0x5e3   : > { %v1612_v4 = vpop.eup %1611 }
 0x5e4   : > { %v926_v5 = vsel %vm583_vm2, %v1612_v4, 0.0 }
 0x5e5   : > { %927 = vadd.xlane.f32.xlu0 %v926_v5 }
 0x5fb   : > { %1041 = vrot.lane.b32.xlu0 %v1892_v51, %s1690_s26 }
 0x5ff   : > { %1039 = vrot.lane.b32.xlu0 %v1898_v55, %s1690_s26  ;;  %v1600_v55 = vld [vmem:[%s2059_s4 + $0x28] sm:$0xff]  }
 0x600   : > { %1493 = vmatpush3.bf16.msra.mxu0 %v1600_v55 }
 0x601   : > { %1504 = vmatprep.subr.bf16.mxu0 %v1685_v2 }
 0x672   : > { %v928_v7 = vpop.xlane.xlu0 %927 }
 0x673   : > { %1613 = vrcp.f32 %v928_v7 }
 0x676   : > { %v1042_v10 = vpop.permute.xlu0 %1041 }
 0x677   : > { %v1047_v12 = vsel %vm536_vm1, %v1042_v10, 0 }
 0x67a   : > { %v1040_v51 = vpop.permute.xlu0 %1039 }
 0x67d   : > { %v1614_v8 = vpop.eup %1613 }
 0x67e   : > { %v930_v9 = vmul.f32 %v1614_v8, %v1612_v4  ;;  %v1230_v4 = vrot.slane %v1885_v34, %v1229_v3 }
 0x680   : > { %v931_v11 = vpack.c.bf16 %v930_v9, %v930_v9 }
 0x682   : > { %1487 = vmatmul.mubr.msk.bf16.vlgmr.msra.gmra.mrb[16].mxu1 %vm583_vm2, %v931_v11 }
 0x683   : > { %1499 = vmatpush3.bf16.xpose.msra.mxu1 %v1047_v12  ;;  %1500 = vmatprep.mubr.msk.bf16.mxu1 %vm1687_vm0, %v1685_v2 }
 0x684   : > { %1510 = vmatprep.subr.bf16.mxu1 %v1685_v2 }
 0x68a   : > { %1501 = vmatmul.mubr.msk.bf16.vlgmr.msra.gmra.mrb[20].mxu1 %vm536_vm1, %v1040_v51 }
 0x68b   : > { %1514 = vmatprep.mubr.msk.bf16.mxu1 %vm1687_vm0, %v1685_v2  ;;  %1511 = vmatpush3.bf16.msra.mxu1 %v1601_v28 }
 0x68c   : > { %1512 = vmatprep.subr.bf16.mxu1 %v1685_v2 }
 0x68f   : > { %1513 = vmatpush3.bf16.msra.mxu1 %v1602_v41 }
 0x755   : > { %v972_v13 = vpop.f32.mrb[16].mxu1 }
 0x756   : > { %v978_v14 = vpack.c.bf16 %v972_v13, %v972_v13  ;;  %v1488_v15 = vpop.f32.mrb[17].mxu1 }
 0x757   : > { %v975_v16 = vpop.f32.mrb[18].mxu1 }
 0x758   : > { %v1489_v17 = vpop.f32.mrb[19].mxu1  ;;  %1495 = vmatmul.mubr.msk.bf16.vlgmr.msra.gmra.mrb[20].mxu0 %vm536_vm1, %v978_v14 }
 0x759   : > { %1506 = vmatprep.mubr.msk.bf16.mxu0 %vm1687_vm0, %v1685_v2 }
 0x75d   : > { %v1083_v18 = vpop.f32.mrb[20].mxu1 }
 0x75e   : > { %v1502_v19 = vpop.f32.mrb[21].mxu1  ;;  %v1089_v20 = vsel %vm583_vm2, %v1083_v18, -inf }
 0x75f   : > { %1090 = vmax.xlane.f32.xlu0 %v1089_v20  ;;  %v1086_v21 = vpop.f32.mrb[22].mxu1 }
 0x760   : > { %v1503_v22 = vpop.f32.mrb[23].mxu1 }
 0x7ec   : > { %v1091_v23 = vpop.xlane.xlu0 %1090 }
 0x7ed   : > { %v1092_v24 = vsub.f32 %v1083_v18, %v1091_v23 }
 0x7ef   : > { %v1093_v25 = vmul.f32 1.442695, %v1092_v24 }
 0x7f1   : > { %1615 = vpow2.f32 %v1093_v25 }
 0x7fb   : > { %v1616_v26 = vpop.eup %1615 }
 0x7fc   : > { %v1095_v27 = vsel %vm583_vm2, %v1616_v26, 0.0 }
 0x7fd   : > { %1096 = vadd.xlane.f32.xlu1 %v1095_v27 }
 0x80e   : > { %1101 = vrot.lane.b32.xlu1 %v1894_v53, %s1690_s26 }
 0x82b   : > { %v1032_v30 = vpop.f32.mrb[20].mxu0 }
 0x82c   : > { %v1038_v31 = vadd.f32 %v1032_v30, %v1960_v54  ;;  %v1496_v33 = vpop.f32.mrb[21].mxu0 }
 0x82d   : > { %v1035_v35 = vpop.f32.mrb[22].mxu0 }
 0x82e   : > { %v1497_v36 = vpop.f32.mrb[23].mxu0 }
 0x88a   : > { %v1097_v37 = vpop.xlane.xlu1 %1096 }
 0x88b   : > { %1617 = vrcp.f32 %v1097_v37 }
 0x88e   : > { %v1102_v38 = vpop.permute.xlu1 %1101 }
 0x88f   : > { %1505 = vmatpush3.bf16.msra.mxu0 %v1102_v38 }
 0x895   : > { %v1618_v39 = vpop.eup %1617 }
 0x896   : > { %v1099_v40 = vmul.f32 %v1618_v39, %v1616_v26 }
 0x898   : > { %v1100_v53 = vpack.c.bf16 %v1099_v40, %v1099_v40 }
 0x89a   : > { %1507 = vmatmul.mubr.msk.bf16.vlgmr.msra.gmra.mrb[24].mxu0 %vm583_vm2, %v1100_v53 }
 0x96d   : > { %v1141_v2 = vpop.f32.mrb[24].mxu0 }
 0x96e   : > { %v1147_v42 = vpack.c.bf16 %v1141_v2, %v1141_v2  ;;  %v1508_v43 = vpop.f32.mrb[25].mxu0 }
 0x96f   : > { %v1144_v44 = vpop.f32.mrb[26].mxu0 }
 0x970   : > { %v1509_v45 = vpop.f32.mrb[27].mxu0  ;;  %1515 = vmatmul.mubr.msk.bf16.vlgmr.msra.gmra.mrb[24].mxu1 %vm536_vm1, %v1147_v42 }
 0xa43   : > { %v1201_v48 = vpop.f32.mrb[24].mxu1 }
 0xa44   : > { %v1207_v49 = vadd.f32 %v1201_v48, %v1038_v31  ;;  %v1516_v50 = vpop.f32.mrb[25].mxu1 }
 0xa45   : > { %v1204_v52 = vpop.f32.mrb[26].mxu1 }
 0xa46   : > { %v1212_v54 = vadd.f32 %v1211_v47, %v1207_v49  ;;  %v1517_v56 = vpop.f32.mrb[27].mxu1 }
 0xa48   : > { %v1213_v57 = vadd.f32 %v1212_v54, %v1868_v29  ;;  %v1235_v29 = vsub.s32 5, %v1879_v32 }
 0xa4a   : > { %1214 = vadd.xlane.f32.xlu1 %v1213_v57  ;;  %v1218_v58 = vmul.f32 %v1213_v57, %v1213_v57  ;;  %v1236_v8 = vrot.slane %v1885_v34, %v1235_v29 }
 0xa4c   : > { %1219 = vadd.xlane.f32.xlu0 %v1218_v58 }
 0xad7   : > { %v1215_v59 = vpop.xlane.xlu1 %1214 }
 0xad8   : > { %v1217_v60 = vmul.f32 0.0078125, %v1215_v59 }
 0xad9   : > { %v1220_v61 = vpop.xlane.xlu0 %1219 }
 0xada   : > { %v1222_v62 = vmul.f32 %v1217_v60, %v1217_v60  ;;  %v1221_v63 = vmul.f32 0.0078125, %v1220_v61  ;;  %v1226_v6 = vsub.f32 %v1213_v57, %v1217_v60 }
 0xadc   : > { %v1223_v0 = vsub.f32 %v1221_v63, %v1222_v62 }
 0xade   : > { %v1224_v1 = vadd.f32 1e-05, %v1223_v0 }
 0xae0   : > { %1619 = vrsqrt.f32 %v1224_v1 }
 0xaea   : > { %v1620_v5 = vpop.eup %1619 }
 0xaeb   : > { %v1231_v7 = vmul.f32 %v1620_v5, %v1230_v4 }
 0xaed   : > { %v1232_v9 = vmul.f32 %v1231_v7, %v1226_v6 }
 0xaef   : > { %v1237_v10 = vadd.f32 %v1236_v8, %v1232_v9 }
 0xaf1   : > { %1238 = vst [vmem:[%s257_s15] sm:$0xff] %v1237_v10 }
 0xaf2   : > { %1634 = shalt.err (!%p1631_p3)
}
 0xaf3   : > { %s1635_s10 = scalar_lea.hbm %s2013_s16, 128  ;;  %s1639_s12 = scalar_lea.hbm %s2061_s6, 256 }
 0xaf4   : > { %p1636_p4 = scmp.ne.s32.totalorder %s2013_s16, %s1635_s10  ;;  %p1640_p9 = scmp.lt.u32.totalorder %s2013_s16, %s2061_s6 }
 0xaf5   : > { %p1641_p10 = scmp.lt.u32.totalorder %s1639_s12, %s1635_s10  ;;  %p1643_p12 = scmp.lt.u32.totalorder %s1635_s10, %s2013_s16 }
 0xaf6   : > { %p1637_p7 = pnand %p1636_p4, %p1765_p5 }
 0xaf7   : > { %p1642_p11 = por %p1641_p10, %p1640_p9 }
 0xaf8   : > { %p1638_p8 = pneg %p1637_p7 }
 0xaf9   : > { %p1644_p13 = por %p1643_p12, %p1642_p11 }
 0xafb   : > { %p1645_p0 = pnand %p1644_p13, %p1638_p8 }
 0xafd   : > { %1648 = shalt.err (!%p1645_p0)
}
 0xafe   : > { %1518 = dma.vmem_to_hbm [thread:$0]  (%p1765_p5), %s2015_s18, 128, %s2013_s16, %s1240_s28  }
 0xaff PF: > { %p1524_p1 = scmp.ge.s32.totalorder %s1683_s24, 2  ;;  %s1265_s15 = sand.u32 1, %s1671_s21  }
 0xb00   : > { %s1266_s19 = scalar_lea.sflag [#allocation3], %s1265_s15 }
 0xb01   : > { %p1521_p2 = pnand %p1524_p1, %p1769_p6 }
 0xb03   : > { %1666 = dma.done.wait (!%p1521_p2), %s1266_s19, 128  }
 0xb04   : > { %1668 = vsyncadd (!%p1521_p2), %s1266_s19, 4294967168  ;;  %p16_p3 = scmp.ge.s32.totalorder %s1752_s27, 4   ;;  %s2064_s21 = smov %s1675_s22 }
 0xb05   : > { %s2065_s22 = smov %s1679_s23  ;;  %s2066_s23 = smov %s1763_s30 }
 0xb06   : > { %s2067_s24 = smov %s1752_s27  ;;  %18 = sbr.rel (!%p16_p3) target bundleno = 3 (0x3), region = 82 }
 0xb0d   :  { %1271 = vsyncpa [#allocation3], 1 }
 0xb0e   :  { %1273 = vsyncpa [#allocation3 + $0x1], 1 }

</bundles_post_ra>
